<compile_context>
chip_gen: v5e
topology: v5e:2x2
jax: 0.10.0
libtpu: 0.0.40
codegen_flags: <defaults>
</compile_context>

<pallas_src>
import jax
import jax.numpy as jnp
from jax.experimental import pallas as pl
from jax.experimental.pallas import tpu as pltpu


_LANE = 128
_SUBLANE = 8


def _linear_kernel(x_ref, w_ref, b_ref, o_ref):
    # x_ref: (TB, F) VMEM (walks the batch axis)
    # w_ref: (1, F)  VMEM (same block every step -> stays resident)
    # b_ref: (1, 1)  SMEM scalar
    # o_ref: (TB, 1)
    x = x_ref[...].astype(jnp.float32)                   # no-op cast for f32 inputs
    w = w_ref[...]                                       # already f32 (hoisted cast)
    prod = x * w                                         # VPU elementwise, (TB, F)
    acc = jnp.sum(prod, axis=-1, keepdims=True)          # XLU lane reduce, (TB, 1) f32
    o_ref[...] = (acc + b_ref[0, 0]).astype(o_ref.dtype)


def _round_up(x, m):
    return ((x + m - 1) // m) * m


def _vmem_budget_bytes():
    """Generation-aware VMEM budget: half of physical VMEM per TensorCore.

    v7x: 64 MiB physical -> 32 MiB budget; v5e/v6e: 128 MiB -> 64 MiB budget.
    Falls back to a v7x-safe 32 MiB if the hardware query is unavailable.
    """
    try:
        cap = pltpu.get_tpu_info().vmem_capacity_bytes
    except Exception:
        cap = 64 * 1024 * 1024
    return cap // 2


def _pick_batch_tile(batch, in_features, budget_bytes):
    """Batch tile: whole batch if small, else a large VMEM-budgeted, 8-aligned tile."""
    # Per batch row the pipeline holds (double-buffered, f32, lane-padded to 128):
    # one x row and one output row.
    f_pad = _round_up(in_features, _LANE)
    bytes_per_row = 2 * 4 * (f_pad + _LANE)
    tb_max = (int(budget_bytes * 0.9) // bytes_per_row) // _SUBLANE * _SUBLANE
    tb_max = max(_SUBLANE, tb_max)

    if batch <= 1024:
        # Single full-extent block (always layout-legal, even if batch % 8 != 0).
        return batch

    # Keep >= 2 grid steps so the "parallel" axis has work for both v7x cores,
    # while each step still moves multi-MiB blocks (step overhead amortized).
    half = _round_up(-(-batch // 2), _SUBLANE)
    return max(_SUBLANE, min(tb_max, half))


def polynomial_regression_forward(x, weight, bias):
    """Forward pass of PolynomialRegression: y = x @ W^T + b.

    x:      (batch, in_features) float32
    weight: (1, in_features)     float32  (PyTorch nn.Linear layout, used as-is)
    bias:   (1,)                 float32
    returns (batch, 1)           float32
    """
    batch, in_features = x.shape

    budget = _vmem_budget_bytes()
    tb = _pick_batch_tile(batch, in_features, budget)
    num_blocks = pl.cdiv(batch, tb)          # ragged last block handled by Pallas

    w_f32 = weight.astype(jnp.float32)       # hoisted (no per-step recast in kernel)
    b_smem = bias.reshape(1, 1).astype(jnp.float32)

    # Advisory cost for XLA's scheduler (memory-bound; no pad copy anymore).
    cost = pl.CostEstimate(
        flops=2 * batch * in_features,
        transcendentals=0,
        bytes_accessed=4 * (batch * in_features + in_features + 1 + batch),
    )

    out = pl.pallas_call(
        _linear_kernel,
        out_shape=jax.ShapeDtypeStruct((batch, 1), x.dtype),
        grid_spec=pltpu.PrefetchScalarGridSpec(
            num_scalar_prefetch=0,
            grid=(num_blocks,),
            in_specs=[
                # x: walk the batch axis; feature axis is the full (lane) extent.
                pl.BlockSpec((tb, in_features), lambda i: (i, 0)),
                # weight: same block every step -> resident in VMEM.
                pl.BlockSpec((1, in_features), lambda i: (0, 0)),
                # bias: scalar in SMEM.
                pl.BlockSpec(memory_space=pltpu.MemorySpace.SMEM),
            ],
            out_specs=pl.BlockSpec((tb, 1), lambda i: (i, 0)),
        ),
        compiler_params=pltpu.CompilerParams(
            # Independent batch tiles -> shard the grid across TensorCores (v7x).
            dimension_semantics=("parallel",),
            # Same generation-aware budget the tile was sized against.
            vmem_limit_bytes=budget,
        ),
        cost_estimate=cost,
    )(x, w_f32, b_smem)

    return out


if __name__ == "__main__":
    key = jax.random.PRNGKey(0)
    k_x, k_w, k_b, k_x2 = jax.random.split(key, 4)

    batch = 8
    in_size = 32  # polynomial feature dimension

    # Same shapes nn.Linear(in_size, 1) would create.
    x = jax.random.normal(k_x, (batch, in_size), dtype=jnp.float32)
    weight = jax.random.normal(k_w, (1, in_size), dtype=jnp.float32) * 0.1
    bias = jax.random.normal(k_b, (1,), dtype=jnp.float32) * 0.1

    y = polynomial_regression_forward(x, weight, bias)
    jax.block_until_ready(y)

    y_ref = x @ weight.T + bias
    assert y.shape == (batch, 1)
    assert jnp.allclose(y, y_ref, atol=1e-5, rtol=1e-5)

    # Also exercise the multi-block, ragged-boundary path (no wrapper pad copy).
    batch2 = 2056  # > 1024 and not a multiple of the chosen tile
    x2 = jax.random.normal(k_x2, (batch2, in_size), dtype=jnp.float32)
    y2 = polynomial_regression_forward(x2, weight, bias)
    jax.block_until_ready(y2)
    y2_ref = x2 @ weight.T + bias
    assert y2.shape == (batch2, 1)
    assert jnp.allclose(y2, y2_ref, atol=1e-5, rtol=1e-5)

    print("KERNEL_OK")
</pallas_src>

<mosaic_0001>
module attributes {stable_mosaic.version = 11 : i64} {
  func.func @_linear_kernel(%arg0: i32, %arg1: memref<8x32xf32, #tpu.memory_space<vmem>>, %arg2: memref<1x32xf32, #tpu.memory_space<vmem>>, %arg3: memref<1x1xf32, #tpu.memory_space<smem>>, %arg4: memref<8x1xf32, #tpu.memory_space<vmem>>) attributes {dimension_semantics = [#tpu.dimension_semantics<parallel>], iteration_bounds = array<i64: 1>, scalar_prefetch = 0 : i64, scratch_operands = 0 : i64, tpu.core_type = #tpu.core_type<tc>, window_params = [{transform_indices = @transform_0, window_bounds = array<i64: 8, 32>}, {pipeline_mode = #tpu.pipeline_mode<synchronous>, transform_indices = @transform_1, window_bounds = array<i64: 1, 32>}, {transform_indices = @transform_2, window_bounds = array<i64: 1, 1>}, {transform_indices = @transform_3, window_bounds = array<i64: 8, 1>}]} {
    %c0 = arith.constant 0 : index
    %c0_0 = arith.constant 0 : index
    %0 = vector.load %arg1[%c0, %c0_0] : memref<8x32xf32, #tpu.memory_space<vmem>>, vector<8x32xf32>
    %c0_1 = arith.constant 0 : index
    %c0_2 = arith.constant 0 : index
    %1 = vector.load %arg2[%c0_1, %c0_2] : memref<1x32xf32, #tpu.memory_space<vmem>>, vector<1x32xf32>
    %2 = vector.broadcast %1 : vector<1x32xf32> to vector<8x32xf32>
    %3 = arith.mulf %0, %2 : vector<8x32xf32>
    %cst = arith.constant dense<0.000000e+00> : vector<8xf32>
    %4 = vector.multi_reduction <add>, %3, %cst [1] : vector<8x32xf32> to vector<8xf32>
    %5 = vector.shape_cast %4 : vector<8xf32> to vector<8x1xf32>
    %c0_3 = arith.constant 0 : index
    %c0_4 = arith.constant 0 : index
    %6 = memref.load %arg3[%c0_3, %c0_4] : memref<1x1xf32, #tpu.memory_space<smem>>
    %7 = vector.broadcast %6 : f32 to vector<8x1xf32>
    %8 = arith.addf %5, %7 : vector<8x1xf32>
    %c0_5 = arith.constant 0 : index
    %c0_6 = arith.constant 0 : index
    %9 = vector.load %arg4[%c0_5, %c0_6] : memref<8x1xf32, #tpu.memory_space<vmem>>, vector<8x1xf32>
    tpu.vector_store %arg4[%c0_5, %c0_6], %8 {strides = array<i32>} : memref<8x1xf32, #tpu.memory_space<vmem>>, vector<8x1xf32>,
    return
  }
  func.func @transform_0(%arg0: i32) -> (i32, i32) {
    %c0_i32 = arith.constant 0 : i32
    %c0_i32_0 = arith.constant 0 : i32
    return %arg0, %c0_i32 : i32, i32
  }
  func.func @transform_1(%arg0: i32) -> (i32, i32) {
    %c0_i32 = arith.constant 0 : i32
    %c0_i32_0 = arith.constant 0 : i32
    %c0_i32_1 = arith.constant 0 : i32
    return %c0_i32, %c0_i32_0 : i32, i32
  }
  func.func @transform_2(%arg0: i32) -> (i32, i32) {
    %c0_i32 = arith.constant 0 : i32
    %c0_i32_0 = arith.constant 0 : i32
    %c0_i32_1 = arith.constant 0 : i32
    return %c0_i32, %c0_i32_0 : i32, i32
  }
  func.func @transform_3(%arg0: i32) -> (i32, i32) {
    %c0_i32 = arith.constant 0 : i32
    %c0_i32_0 = arith.constant 0 : i32
    return %arg0, %c0_i32 : i32, i32
  }
}

</mosaic_0001>

<bundles_post_ra>
// kernel: tpu_custom_call.1
= control target key start
LH: loop header
LB: loop body
LE: loop exit
PB: predicated region body
PF: predicated region fallthrough
CT: control target
= control target key end

     0   :  { %9 = vsyncpa [#allocation4], 0  ;;  %s77_s15 = smov [#allocation3]   ;;  %s110_s0 = inlined_call_operand.hbm [shape: f32[8,32], index: 0, kind: input, shape index: {}]   ;;  %s111_s1 = inlined_call_operand.vmem [shape: f32[1,32], index: 1, kind: input, shape index: {}]   ;;  %s112_s2 = inlined_call_operand.<no memory space> [shape: f32[1,1], index: 2, kind: input, shape index: {}]   ;;  %s113_s3 = inlined_call_operand.vmem [shape: f32[8,1], index: 3, kind: output, shape index: {}]  }
   0x1   :  { %s15_s14 = sshll.u32 %s110_s0, 4  ;;  %s17_s16 = sshll.u32 %s77_s15, 4  ;;  %s16_s14 = int_to_ptr.hbm [resolvable:$true] %s15_s14  ;;  %s18_s16 = int_to_ptr.vmem [resolvable:$true] %s17_s16 }
   0x2   :  { %20 = dma.hbm_to_vmem [thread:$0]  %s16_s14, 128, %s18_s16, [#allocation4]  }
   0x3   :  { %75 = dma.done.wait [#allocation4], 128  }
   0x4   :  { %76 = vsyncadd [#allocation4], 4294967168  ;;  %v29_v0 = vld [vmem:[#allocation3] sm:$0xff]  ;;  %vm35_vm0 = vcmask 261120   ;;  %v40_v4 = vstv %s112_s2  ;;  %vm42_vm1 = vcmask 7168  }
   0x5   :  { %v50_v1 = vld [vmem:[%s111_s1] ss:$0 sm:$0xff] }
   0x6   :  { %v34_v2 = vmul.f32 %v50_v1, %v29_v0 }
   0x8   :  { %v36_v3 = vsel %vm35_vm0, %v34_v2, 0.0 }
   0x9   :  { %37 = vadd.xlane.f32.xlu0 %v36_v3 }
  0x7c   :  { %v38_v5 = vpop.xlane.xlu0 %37 }
  0x7d   :  { %v41_v6 = vadd.f32 %v40_v4, %v38_v5 }
  0x7f   :  { %43 = vst.msk [vmem:[%s113_s3] sm:$0xff] %vm42_vm1, %v41_v6 }
  0x80   :  { %48 = vsyncpa [#allocation4], 1 }

</bundles_post_ra>
